<compile_context>
chip_gen: v5e
topology: v5e:2x2
jax: 0.10.0
libtpu: 0.0.40
codegen_flags: <defaults>
</compile_context>

<pallas_src>
import functools

import jax
import jax.numpy as jnp
from jax.experimental import pallas as pl
from jax.experimental.pallas import tpu as pltpu


def _round_up(x, m):
    return ((x + m - 1) // m) * m


def _tpu_vmem_capacity_bytes():
    try:
        return int(pltpu.get_tpu_info().vmem_capacity_bytes)
    except Exception:
        return 64 << 20  # conservative (v7x per-TC VMEM)


def _pick_tk(d_pad, tk_target):
    """Largest multiple of 128 that divides d_pad and is <= tk_target."""
    m = d_pad // 128
    best = 1
    for d in range(1, m + 1):
        if m % d == 0 and d * 128 <= tk_target:
            best = d
    return best * 128


# ----------------------------------------------------------------------------
# Pallas kernel: K-tiled GEMM1 accumulate + fused (ReLU, GEMM2, ReLU, GEMM3)
# tail on the last K step.  Grid = (batch tiles, K tiles).  acc_ref is an f32
# VMEM scratch of shape (TB, H_pad).
# ----------------------------------------------------------------------------
def _class_mlp_kernel(x_ref, w1_ref, b1_ref, w2_ref, b2_ref, w3_ref, b3_ref,
                      o_ref, acc_ref):
    k = pl.program_id(1)

    # GEMM1 partial: bf16 operands on the MXU, f32 accumulation.
    p1 = jnp.dot(x_ref[...], w1_ref[...], preferred_element_type=jnp.float32)

    @pl.when(k == 0)
    def _first():
        # First K step writes directly (no zero-init RMW) and folds in fc1 bias.
        acc_ref[...] = p1 + b1_ref[...]

    @pl.when(k != 0)
    def _accumulate():
        acc_ref[...] += p1

    @pl.when(k == pl.num_programs(1) - 1)
    def _finalize():
        h = jnp.maximum(acc_ref[...], 0.0)           # ReLU (bias already folded)
        # dropout(p=0.1): identity in inference mode.
        h2 = jnp.dot(h.astype(w2_ref.dtype), w2_ref[...],
                     preferred_element_type=jnp.float32)
        h2 = jnp.maximum(h2 + b2_ref[...], 0.0)
        # dropout(p=0.1): identity in inference mode.
        y = jnp.dot(h2.astype(w3_ref.dtype), w3_ref[...],
                    preferred_element_type=jnp.float32)
        o_ref[...] = (y + b3_ref[...]).astype(o_ref.dtype)


# ----------------------------------------------------------------------------
# One-time (model-load) weight preparation: fold the transpose(1,2)+flatten
# permutation into W1, pad to lane-dense shapes, cast to bf16.
# ----------------------------------------------------------------------------
def permute_fc1_for_direct_layout(w1, C, S_total):
    """x.reshape(B, S*C) @ W1' == transpose(1,2)+flatten path @ W1."""
    H = w1.shape[1]
    return w1.reshape(C, S_total, H).transpose(1, 0, 2).reshape(S_total * C, H)


def prepare_class_mlp_weights(w1, b1, w2, b2, w3, b3, *, C=None, S_total=None):
    """Returns (w1p, b1p, w2p, b2p, w3p, b3p) padded/bf16, done ONCE at load."""
    if C is not None and S_total is not None:
        w1 = permute_fc1_for_direct_layout(w1, C, S_total)
    D, H = w1.shape
    N = w3.shape[1]
    D_pad = _round_up(D, 128)
    H_pad = _round_up(H, 128)
    N_pad = _round_up(N, 128)
    f32, bf16 = jnp.float32, jnp.bfloat16

    w1p = jnp.zeros((D_pad, H_pad), bf16).at[:D, :H].set(w1.astype(bf16))
    w2p = jnp.zeros((H_pad, H_pad), bf16).at[:H, :H].set(w2.astype(bf16))
    w3p = jnp.zeros((H_pad, N_pad), bf16).at[:H, :N].set(w3.astype(bf16))
    b1p = jnp.zeros((1, H_pad), f32).at[:, :H].set(b1.reshape(1, -1).astype(f32))
    b2p = jnp.zeros((1, H_pad), f32).at[:, :H].set(b2.reshape(1, -1).astype(f32))
    b3p = jnp.zeros((1, N_pad), f32).at[:, :N].set(b3.reshape(1, -1).astype(f32))
    return w1p, b1p, w2p, b2p, w3p, b3p


# ----------------------------------------------------------------------------
# Per-call jitted wrapper: pads the activation only, picks generation-aware
# tiles, and launches the pallas_call.
#   x_flat: (B, D) contiguous hs.reshape(B, S_total*C) (no HBM transpose);
#   weights pre-padded by prepare_class_mlp_weights().
# ----------------------------------------------------------------------------
@functools.partial(jax.jit, static_argnames=("num_classes", "tile_b", "tile_k",
                                             "single_buffer_residents"))
def class_mlp_pallas(x_flat, w1p, b1p, w2p, b2p, w3p, b3p, *, num_classes,
                     tile_b=256, tile_k=None, single_buffer_residents=True):
    B, D = x_flat.shape
    D_pad, H_pad = w1p.shape
    N_pad = w3p.shape[1]
    assert D <= D_pad and num_classes <= N_pad
    f32, bf16 = jnp.float32, jnp.bfloat16

    # ---- generation-aware VMEM budget + tile targets ------------------------
    vmem_cap = _tpu_vmem_capacity_bytes()
    if vmem_cap >= (100 << 20):          # v5e / v6e: 128 MiB physical VMEM
        vmem_budget = 96 << 20
        tk_default = 4096
    else:                                # v7x (64 MiB per TC) or unknown
        vmem_budget = 44 << 20
        tk_default = 1024
    tk_target = tile_k if tile_k is not None else tk_default
    headroom = 6 << 20                   # epilogue temps + compiler scratch slack

    buf_factor = 1 if single_buffer_residents else 2

    def est_vmem(tb, tk):
        resid = buf_factor * (H_pad * H_pad * 2 + H_pad * N_pad * 2
                              + (2 * H_pad + N_pad) * 4)
        stream = 2 * tb * tk * 2 + 2 * tk * H_pad * 2      # x / W1 double-buffered
        outb = 2 * tb * N_pad * 4
        acc = tb * H_pad * 4
        epi = tb * H_pad * (2 + 4) + tb * N_pad * 4        # h (bf16), h2 (f32), y
        return resid + stream + outb + acc + epi

    # ---- tile sizing: shrink TK first, then TB, until the budget fits -------
    B8 = _round_up(B, 8)
    TB = max(8, (min(B8, tile_b) // 8) * 8)
    while True:
        t = tk_target
        while True:
            TK = _pick_tk(D_pad, t)
            if est_vmem(TB, TK) + headroom <= vmem_budget or TK == 128:
                break
            t = TK // 2
        if est_vmem(TB, TK) + headroom <= vmem_budget or TB <= 8:
            break
        TB = max(8, ((TB // 2) // 8) * 8)
    B_pad = _round_up(B8, TB)

    # ---- pad the activation only (weights were padded at load time) ---------
    xb = jnp.zeros((B_pad, D_pad), bf16).at[:B, :D].set(x_flat.astype(bf16))

    grid = (B_pad // TB, D_pad // TK)

    vmem_limit = int(min(vmem_budget, max(est_vmem(TB, TK) + headroom, 16 << 20)))

    n_btiles = B_pad // TB
    flops = 2 * B_pad * (D_pad * H_pad + H_pad * H_pad + H_pad * N_pad)
    bytes_accessed = (xb.size * 2 + w1p.size * 2 * n_btiles
                      + w2p.size * 2 + w3p.size * 2
                      + (b1p.size + b2p.size + b3p.size) * 4
                      + B_pad * N_pad * 4)

    def _resident(shape):
        if single_buffer_residents:
            return pl.BlockSpec(shape, lambda i, k: (0, 0),
                                pipeline_mode=pl.Buffered(buffer_count=1))
        return pl.BlockSpec(shape, lambda i, k: (0, 0))

    out = pl.pallas_call(
        _class_mlp_kernel,
        out_shape=jax.ShapeDtypeStruct((B_pad, N_pad), f32),
        grid_spec=pltpu.PrefetchScalarGridSpec(
            num_scalar_prefetch=0,
            grid=grid,
            in_specs=[
                pl.BlockSpec((TB, TK), lambda i, k: (i, k)),      # x (streamed)
                pl.BlockSpec((TK, H_pad), lambda i, k: (k, 0)),   # W1 (streamed)
                _resident((1, H_pad)),                            # b1 (resident)
                _resident((H_pad, H_pad)),                        # W2 (resident)
                _resident((1, H_pad)),                            # b2 (resident)
                _resident((H_pad, N_pad)),                        # W3 (resident)
                _resident((1, N_pad)),                            # b3 (resident)
            ],
            out_specs=pl.BlockSpec((TB, N_pad), lambda i, k: (i, 0)),
            scratch_shapes=[pltpu.VMEM((TB, H_pad), f32)],
        ),
        compiler_params=pltpu.CompilerParams(
            dimension_semantics=("parallel", "arbitrary"),
            vmem_limit_bytes=vmem_limit),
        cost_estimate=pl.CostEstimate(flops=int(flops), transcendentals=0,
                                      bytes_accessed=int(bytes_accessed)),
    )(xb, w1p, b1p, w2p, b2p, w3p, b3p)

    return out[:B, :num_classes]


# ----------------------------------------------------------------------------
# Glue: dict-of-features -> MLP input.
# ----------------------------------------------------------------------------
def _gather_features(x_dict):
    hs = [x_dict[name] for name in x_dict if 'FPN1_' not in name]
    return jnp.concatenate(hs, axis=1)            # (B, S_total, C)


def build_mlp_input_ref(x_dict):
    hs = _gather_features(x_dict)                 # (B, S_total, C)
    hs = jnp.transpose(hs, (0, 2, 1))             # (B, C, S_total)
    return hs.reshape(hs.shape[0], -1)            # (B, C * S_total)


def build_mlp_input_direct(x_dict):
    hs = _gather_features(x_dict)                 # (B, S_total, C)
    return hs.reshape(hs.shape[0], -1)            # (B, S_total * C), contiguous


# ----------------------------------------------------------------------------
# Deterministic parameter init (Xavier-uniform weights, zero biases) + reference.
# ----------------------------------------------------------------------------
def xavier_uniform(key, fan_in, fan_out):
    bound = jnp.sqrt(6.0 / (fan_in + fan_out))
    return jax.random.uniform(key, (fan_in, fan_out), jnp.float32,
                              minval=-bound, maxval=bound)


def init_class_mlp_params(key, input_dim, hidden_dim, num_classes):
    k1, k2, k3 = jax.random.split(key, 3)
    w1 = xavier_uniform(k1, input_dim, hidden_dim)
    b1 = jnp.zeros((1, hidden_dim), jnp.float32)
    w2 = xavier_uniform(k2, hidden_dim, hidden_dim)
    b2 = jnp.zeros((1, hidden_dim), jnp.float32)
    w3 = xavier_uniform(k3, hidden_dim, num_classes)
    b3 = jnp.zeros((1, num_classes), jnp.float32)
    return w1, b1, w2, b2, w3, b3


def class_mlp_ref(x_flat, w1, b1, w2, b2, w3, b3):
    h = jnp.maximum(x_flat @ w1 + b1, 0.0)
    h = jnp.maximum(h @ w2 + b2, 0.0)
    return h @ w3 + b3


if __name__ == "__main__":
    key = jax.random.PRNGKey(0)

    # Small synthetic shapes consistent with the module's forward:
    B = 2            # batch
    C = 4            # fpn_size / per-token channel dim
    S1, S2 = 8, 8    # sequence lengths of the two kept feature maps
    S_total = S1 + S2
    hidden_dim = 32
    num_classes = 8
    input_dim = C * S_total   # 64

    k_in1, k_in2, k_skip, k_param = jax.random.split(key, 4)
    x_dict = {
        "layer1": jax.random.normal(k_in1, (B, S1, C), jnp.float32),
        "FPN1_layer1": jax.random.normal(k_skip, (B, S1, C), jnp.float32),  # skipped
        "layer2": jax.random.normal(k_in2, (B, S2, C), jnp.float32),
    }

    w1, b1, w2, b2, w3, b3 = init_class_mlp_params(
        k_param, input_dim, hidden_dim, num_classes)

    # One-time weight prep (transpose fold + pad + bf16 cast), done at "load".
    params_padded = prepare_class_mlp_weights(w1, b1, w2, b2, w3, b3,
                                              C=C, S_total=S_total)

    x_direct = build_mlp_input_direct(x_dict)     # (B, S_total*C) contiguous

    def run(single_buffer):
        return class_mlp_pallas(x_direct, *params_padded,
                                num_classes=num_classes,
                                single_buffer_residents=single_buffer)

    try:
        out = jax.block_until_ready(run(True))
    except Exception:
        # Fallback if this JAX build rejects pipeline_mode=pl.Buffered(1).
        out = jax.block_until_ready(run(False))

    assert out.shape == (B, num_classes)

    # Reference 1: exact PyTorch semantics (transpose path, f32) — loose check
    # since the kernel uses bf16 MXU inputs with f32 accumulation.
    x_ref = build_mlp_input_ref(x_dict)
    ref_f32 = class_mlp_ref(x_ref, w1, b1, w2, b2, w3, b3)
    assert jnp.allclose(out, ref_f32, atol=5e-2, rtol=5e-2), \
        "mismatch vs f32 JAX reference (semantics)"

    # Reference 2: same bf16-rounded operands, f32 math — tight check of the
    # kernel's arithmetic / layout / padding.
    bf = jnp.bfloat16
    ref_bf16 = class_mlp_ref(
        x_ref.astype(bf).astype(jnp.float32),
        w1.astype(bf).astype(jnp.float32), b1,
        w2.astype(bf).astype(jnp.float32), b2,
        w3.astype(bf).astype(jnp.float32), b3)
    assert jnp.allclose(out, ref_bf16, atol=2e-3, rtol=2e-3), \
        "mismatch vs bf16-input JAX reference (kernel arithmetic)"

    print("KERNEL_OK")
</pallas_src>

<mosaic_0001>
module attributes {stable_mosaic.version = 11 : i64} {
  func.func @_class_mlp_kernel(%arg0: i32, %arg1: i32, %arg2: memref<8x128xbf16, #tpu.memory_space<vmem>>, %arg3: memref<128x128xbf16, #tpu.memory_space<vmem>>, %arg4: memref<1x128xf32, #tpu.memory_space<vmem>>, %arg5: memref<128x128xbf16, #tpu.memory_space<vmem>>, %arg6: memref<1x128xf32, #tpu.memory_space<vmem>>, %arg7: memref<128x128xbf16, #tpu.memory_space<vmem>>, %arg8: memref<1x128xf32, #tpu.memory_space<vmem>>, %arg9: memref<8x128xf32, #tpu.memory_space<vmem>>, %arg10: memref<8x128xf32, #tpu.memory_space<vmem>>) attributes {dimension_semantics = [#tpu.dimension_semantics<parallel>, #tpu.dimension_semantics<arbitrary>], iteration_bounds = array<i64: 1, 1>, scalar_prefetch = 0 : i64, scratch_operands = 1 : i64, tpu.core_type = #tpu.core_type<tc>, window_params = [{transform_indices = @transform_0, window_bounds = array<i64: 8, 128>}, {transform_indices = @transform_1, window_bounds = array<i64: 128, 128>}, {pipeline_mode = #tpu.pipeline_mode<synchronous>, transform_indices = @transform_2, window_bounds = array<i64: 1, 128>}, {pipeline_mode = #tpu.pipeline_mode<synchronous>, transform_indices = @transform_3, window_bounds = array<i64: 128, 128>}, {pipeline_mode = #tpu.pipeline_mode<synchronous>, transform_indices = @transform_4, window_bounds = array<i64: 1, 128>}, {pipeline_mode = #tpu.pipeline_mode<synchronous>, transform_indices = @transform_5, window_bounds = array<i64: 128, 128>}, {pipeline_mode = #tpu.pipeline_mode<synchronous>, transform_indices = @transform_6, window_bounds = array<i64: 1, 128>}, {transform_indices = @transform_7, window_bounds = array<i64: 8, 128>}]} {
    %c0 = arith.constant 0 : index
    %c0_0 = arith.constant 0 : index
    %0 = vector.load %arg2[%c0, %c0_0] : memref<8x128xbf16, #tpu.memory_space<vmem>>, vector<8x128xbf16>
    %c0_1 = arith.constant 0 : index
    %c0_2 = arith.constant 0 : index
    %1 = vector.load %arg3[%c0_1, %c0_2] : memref<128x128xbf16, #tpu.memory_space<vmem>>, vector<128x128xbf16>
    %cst = arith.constant dense<0.000000e+00> : vector<8x128xf32>
    %2 = tpu.matmul %0, %1, %cst {dimension_numbers = #tpu.dot_dimension_numbers<[1], [0], [0], [1], [0, 0, 1, 1], [], []>} : vector<8x128xbf16>, vector<128x128xbf16>, vector<8x128xf32> -> vector<8x128xf32>
    %c0_i32 = arith.constant 0 : i32
    %3 = arith.cmpi eq, %arg1, %c0_i32 : i32
    %4 = arith.extui %3 : i1 to i32
    %c0_i32_3 = arith.constant 0 : i32
    %5 = arith.cmpi ne, %4, %c0_i32_3 : i32
    scf.if %5 {
      %c0_8 = arith.constant 0 : index
      %c0_9 = arith.constant 0 : index
      %12 = vector.load %arg4[%c0_8, %c0_9] : memref<1x128xf32, #tpu.memory_space<vmem>>, vector<1x128xf32>
      %13 = vector.broadcast %12 : vector<1x128xf32> to vector<8x128xf32>
      %14 = arith.addf %2, %13 : vector<8x128xf32>
      %c0_10 = arith.constant 0 : index
      %c0_11 = arith.constant 0 : index
      %15 = vector.load %arg10[%c0_10, %c0_11] : memref<8x128xf32, #tpu.memory_space<vmem>>, vector<8x128xf32>
      tpu.vector_store %arg10[%c0_10, %c0_11], %14 {strides = array<i32>} : memref<8x128xf32, #tpu.memory_space<vmem>>, vector<8x128xf32>,
    } else {
    }
    %c0_i32_4 = arith.constant 0 : i32
    %6 = arith.cmpi ne, %arg1, %c0_i32_4 : i32
    %7 = arith.extui %6 : i1 to i32
    %c0_i32_5 = arith.constant 0 : i32
    %8 = arith.cmpi ne, %7, %c0_i32_5 : i32
    scf.if %8 {
      %c0_8 = arith.constant 0 : index
      %c0_9 = arith.constant 0 : index
      %12 = vector.load %arg10[%c0_8, %c0_9] : memref<8x128xf32, #tpu.memory_space<vmem>>, vector<8x128xf32>
      %13 = arith.addf %12, %2 : vector<8x128xf32>
      %c0_10 = arith.constant 0 : index
      %c0_11 = arith.constant 0 : index
      %14 = vector.load %arg10[%c0_10, %c0_11] : memref<8x128xf32, #tpu.memory_space<vmem>>, vector<8x128xf32>
      tpu.vector_store %arg10[%c0_10, %c0_11], %13 {strides = array<i32>} : memref<8x128xf32, #tpu.memory_space<vmem>>, vector<8x128xf32>,
    } else {
    }
    %c0_i32_6 = arith.constant 0 : i32
    %9 = arith.cmpi eq, %arg1, %c0_i32_6 : i32
    %10 = arith.extui %9 : i1 to i32
    %c0_i32_7 = arith.constant 0 : i32
    %11 = arith.cmpi ne, %10, %c0_i32_7 : i32
    scf.if %11 {
      %c0_8 = arith.constant 0 : index
      %c0_9 = arith.constant 0 : index
      %12 = vector.load %arg10[%c0_8, %c0_9] : memref<8x128xf32, #tpu.memory_space<vmem>>, vector<8x128xf32>
      %cst_10 = arith.constant 0.000000e+00 : f32
      %13 = vector.broadcast %cst_10 : f32 to vector<8x128xf32>
      %14 = arith.maximumf %12, %13 : vector<8x128xf32>
      %15 = arith.truncf %14 : vector<8x128xf32> to vector<8x128xbf16>
      %c0_11 = arith.constant 0 : index
      %c0_12 = arith.constant 0 : index
      %16 = vector.load %arg5[%c0_11, %c0_12] : memref<128x128xbf16, #tpu.memory_space<vmem>>, vector<128x128xbf16>
      %cst_13 = arith.constant dense<0.000000e+00> : vector<8x128xf32>
      %17 = tpu.matmul %15, %16, %cst_13 {dimension_numbers = #tpu.dot_dimension_numbers<[1], [0], [0], [1], [0, 0, 1, 1], [], []>} : vector<8x128xbf16>, vector<128x128xbf16>, vector<8x128xf32> -> vector<8x128xf32>
      %c0_14 = arith.constant 0 : index
      %c0_15 = arith.constant 0 : index
      %18 = vector.load %arg6[%c0_14, %c0_15] : memref<1x128xf32, #tpu.memory_space<vmem>>, vector<1x128xf32>
      %19 = vector.broadcast %18 : vector<1x128xf32> to vector<8x128xf32>
      %20 = arith.addf %17, %19 : vector<8x128xf32>
      %cst_16 = arith.constant 0.000000e+00 : f32
      %21 = vector.broadcast %cst_16 : f32 to vector<8x128xf32>
      %22 = arith.maximumf %20, %21 : vector<8x128xf32>
      %23 = arith.truncf %22 : vector<8x128xf32> to vector<8x128xbf16>
      %c0_17 = arith.constant 0 : index
      %c0_18 = arith.constant 0 : index
      %24 = vector.load %arg7[%c0_17, %c0_18] : memref<128x128xbf16, #tpu.memory_space<vmem>>, vector<128x128xbf16>
      %cst_19 = arith.constant dense<0.000000e+00> : vector<8x128xf32>
      %25 = tpu.matmul %23, %24, %cst_19 {dimension_numbers = #tpu.dot_dimension_numbers<[1], [0], [0], [1], [0, 0, 1, 1], [], []>} : vector<8x128xbf16>, vector<128x128xbf16>, vector<8x128xf32> -> vector<8x128xf32>
      %c0_20 = arith.constant 0 : index
      %c0_21 = arith.constant 0 : index
      %26 = vector.load %arg8[%c0_20, %c0_21] : memref<1x128xf32, #tpu.memory_space<vmem>>, vector<1x128xf32>
      %27 = vector.broadcast %26 : vector<1x128xf32> to vector<8x128xf32>
      %28 = arith.addf %25, %27 : vector<8x128xf32>
      %c0_22 = arith.constant 0 : index
      %c0_23 = arith.constant 0 : index
      %29 = vector.load %arg9[%c0_22, %c0_23] : memref<8x128xf32, #tpu.memory_space<vmem>>, vector<8x128xf32>
      tpu.vector_store %arg9[%c0_22, %c0_23], %28 {strides = array<i32>} : memref<8x128xf32, #tpu.memory_space<vmem>>, vector<8x128xf32>,
    } else {
    }
    return
  }
  func.func @transform_0(%arg0: i32, %arg1: i32) -> (i32, i32) {
    %c0_i32 = arith.constant 0 : i32
    return %arg0, %arg1 : i32, i32
  }
  func.func @transform_1(%arg0: i32, %arg1: i32) -> (i32, i32) {
    %c0_i32 = arith.constant 0 : i32
    %c0_i32_0 = arith.constant 0 : i32
    return %arg1, %c0_i32 : i32, i32
  }
  func.func @transform_2(%arg0: i32, %arg1: i32) -> (i32, i32) {
    %c0_i32 = arith.constant 0 : i32
    %c0_i32_0 = arith.constant 0 : i32
    %c0_i32_1 = arith.constant 0 : i32
    return %c0_i32, %c0_i32_0 : i32, i32
  }
  func.func @transform_3(%arg0: i32, %arg1: i32) -> (i32, i32) {
    %c0_i32 = arith.constant 0 : i32
    %c0_i32_0 = arith.constant 0 : i32
    %c0_i32_1 = arith.constant 0 : i32
    return %c0_i32, %c0_i32_0 : i32, i32
  }
  func.func @transform_4(%arg0: i32, %arg1: i32) -> (i32, i32) {
    %c0_i32 = arith.constant 0 : i32
    %c0_i32_0 = arith.constant 0 : i32
    %c0_i32_1 = arith.constant 0 : i32
    return %c0_i32, %c0_i32_0 : i32, i32
  }
  func.func @transform_5(%arg0: i32, %arg1: i32) -> (i32, i32) {
    %c0_i32 = arith.constant 0 : i32
    %c0_i32_0 = arith.constant 0 : i32
    %c0_i32_1 = arith.constant 0 : i32
    return %c0_i32, %c0_i32_0 : i32, i32
  }
  func.func @transform_6(%arg0: i32, %arg1: i32) -> (i32, i32) {
    %c0_i32 = arith.constant 0 : i32
    %c0_i32_0 = arith.constant 0 : i32
    %c0_i32_1 = arith.constant 0 : i32
    return %c0_i32, %c0_i32_0 : i32, i32
  }
  func.func @transform_7(%arg0: i32, %arg1: i32) -> (i32, i32) {
    %c0_i32 = arith.constant 0 : i32
    %c0_i32_0 = arith.constant 0 : i32
    return %arg0, %c0_i32 : i32, i32
  }
}

module attributes {stable_mosaic.version = 11 : i64} {
  func.func @_class_mlp_kernel(%arg0: i32, %arg1: i32, %arg2: memref<8x128xbf16, #tpu.memory_space<vmem>>, %arg3: memref<128x128xbf16, #tpu.memory_space<vmem>>, %arg4: memref<1x128xf32, #tpu.memory_space<vmem>>, %arg5: memref<128x128xbf16, #tpu.memory_space<vmem>>, %arg6: memref<1x128xf32, #tpu.memory_space<vmem>>, %arg7: memref<128x128xbf16, #tpu.memory_space<vmem>>, %arg8: memref<1x128xf32, #tpu.memory_space<vmem>>, %arg9: memref<8x128xf32, #tpu.memory_space<vmem>>, %arg10: memref<8x128xf32, #tpu.memory_space<vmem>>) attributes {dimension_semantics = [#tpu.dimension_semantics<parallel>, #tpu.dimension_semantics<arbitrary>], iteration_bounds = array<i64: 1, 1>, scalar_prefetch = 0 : i64, scratch_operands = 1 : i64, tpu.core_type = #tpu.core_type<tc>, window_params = [{transform_indices = @transform_0, window_bounds = array<i64: 8, 128>}, {transform_indices = @transform_1, window_bounds = array<i64: 128, 128>}, {pipeline_mode = #tpu.pipeline_mode<synchronous>, transform_indices = @transform_2, window_bounds = array<i64: 1, 128>}, {pipeline_mode = #tpu.pipeline_mode<synchronous>, transform_indices = @transform_3, window_bounds = array<i64: 128, 128>}, {pipeline_mode = #tpu.pipeline_mode<synchronous>, transform_indices = @transform_4, window_bounds = array<i64: 1, 128>}, {pipeline_mode = #tpu.pipeline_mode<synchronous>, transform_indices = @transform_5, window_bounds = array<i64: 128, 128>}, {pipeline_mode = #tpu.pipeline_mode<synchronous>, transform_indices = @transform_6, window_bounds = array<i64: 1, 128>}, {transform_indices = @transform_7, window_bounds = array<i64: 8, 128>}]} {
    %c0 = arith.constant 0 : index
    %c0_0 = arith.constant 0 : index
    %0 = vector.load %arg2[%c0, %c0_0] : memref<8x128xbf16, #tpu.memory_space<vmem>>, vector<8x128xbf16>
    %c0_1 = arith.constant 0 : index
    %c0_2 = arith.constant 0 : index
    %1 = vector.load %arg3[%c0_1, %c0_2] : memref<128x128xbf16, #tpu.memory_space<vmem>>, vector<128x128xbf16>
    %cst = arith.constant dense<0.000000e+00> : vector<8x128xf32>
    %2 = tpu.matmul %0, %1, %cst {dimension_numbers = #tpu.dot_dimension_numbers<[1], [0], [0], [1], [0, 0, 1, 1], [], []>} : vector<8x128xbf16>, vector<128x128xbf16>, vector<8x128xf32> -> vector<8x128xf32>
    %c0_i32 = arith.constant 0 : i32
    %3 = arith.cmpi eq, %arg1, %c0_i32 : i32
    %4 = arith.extui %3 : i1 to i32
    %c0_i32_3 = arith.constant 0 : i32
    %5 = arith.cmpi ne, %4, %c0_i32_3 : i32
    scf.if %5 {
      %c0_8 = arith.constant 0 : index
      %c0_9 = arith.constant 0 : index
      %12 = vector.load %arg4[%c0_8, %c0_9] : memref<1x128xf32, #tpu.memory_space<vmem>>, vector<1x128xf32>
      %13 = vector.broadcast %12 : vector<1x128xf32> to vector<8x128xf32>
      %14 = arith.addf %2, %13 : vector<8x128xf32>
      %c0_10 = arith.constant 0 : index
      %c0_11 = arith.constant 0 : index
      %15 = vector.load %arg10[%c0_10, %c0_11] : memref<8x128xf32, #tpu.memory_space<vmem>>, vector<8x128xf32>
      tpu.vector_store %arg10[%c0_10, %c0_11], %14 {strides = array<i32>} : memref<8x128xf32, #tpu.memory_space<vmem>>, vector<8x128xf32>,
    } else {
    }
    %c0_i32_4 = arith.constant 0 : i32
    %6 = arith.cmpi ne, %arg1, %c0_i32_4 : i32
    %7 = arith.extui %6 : i1 to i32
    %c0_i32_5 = arith.constant 0 : i32
    %8 = arith.cmpi ne, %7, %c0_i32_5 : i32
    scf.if %8 {
      %c0_8 = arith.constant 0 : index
      %c0_9 = arith.constant 0 : index
      %12 = vector.load %arg10[%c0_8, %c0_9] : memref<8x128xf32, #tpu.memory_space<vmem>>, vector<8x128xf32>
      %13 = arith.addf %12, %2 : vector<8x128xf32>
      %c0_10 = arith.constant 0 : index
      %c0_11 = arith.constant 0 : index
      %14 = vector.load %arg10[%c0_10, %c0_11] : memref<8x128xf32, #tpu.memory_space<vmem>>, vector<8x128xf32>
      tpu.vector_store %arg10[%c0_10, %c0_11], %13 {strides = array<i32>} : memref<8x128xf32, #tpu.memory_space<vmem>>, vector<8x128xf32>,
    } else {
    }
    %c0_i32_6 = arith.constant 0 : i32
    %9 = arith.cmpi eq, %arg1, %c0_i32_6 : i32
    %10 = arith.extui %9 : i1 to i32
    %c0_i32_7 = arith.constant 0 : i32
    %11 = arith.cmpi ne, %10, %c0_i32_7 : i32
    scf.if %11 {
      %c0_8 = arith.constant 0 : index
      %c0_9 = arith.constant 0 : index
      %12 = vector.load %arg10[%c0_8, %c0_9] : memref<8x128xf32, #tpu.memory_space<vmem>>, vector<8x128xf32>
      %cst_10 = arith.constant 0.000000e+00 : f32
      %13 = vector.broadcast %cst_10 : f32 to vector<8x128xf32>
      %14 = arith.maximumf %12, %13 : vector<8x128xf32>
      %15 = arith.truncf %14 : vector<8x128xf32> to vector<8x128xbf16>
      %c0_11 = arith.constant 0 : index
      %c0_12 = arith.constant 0 : index
      %16 = vector.load %arg5[%c0_11, %c0_12] : memref<128x128xbf16, #tpu.memory_space<vmem>>, vector<128x128xbf16>
      %cst_13 = arith.constant dense<0.000000e+00> : vector<8x128xf32>
      %17 = tpu.matmul %15, %16, %cst_13 {dimension_numbers = #tpu.dot_dimension_numbers<[1], [0], [0], [1], [0, 0, 1, 1], [], []>} : vector<8x128xbf16>, vector<128x128xbf16>, vector<8x128xf32> -> vector<8x128xf32>
      %c0_14 = arith.constant 0 : index
      %c0_15 = arith.constant 0 : index
      %18 = vector.load %arg6[%c0_14, %c0_15] : memref<1x128xf32, #tpu.memory_space<vmem>>, vector<1x128xf32>
      %19 = vector.broadcast %18 : vector<1x128xf32> to vector<8x128xf32>
      %20 = arith.addf %17, %19 : vector<8x128xf32>
      %cst_16 = arith.constant 0.000000e+00 : f32
      %21 = vector.broadcast %cst_16 : f32 to vector<8x128xf32>
      %22 = arith.maximumf %20, %21 : vector<8x128xf32>
      %23 = arith.truncf %22 : vector<8x128xf32> to vector<8x128xbf16>
      %c0_17 = arith.constant 0 : index
      %c0_18 = arith.constant 0 : index
      %24 = vector.load %arg7[%c0_17, %c0_18] : memref<128x128xbf16, #tpu.memory_space<vmem>>, vector<128x128xbf16>
      %cst_19 = arith.constant dense<0.000000e+00> : vector<8x128xf32>
      %25 = tpu.matmul %23, %24, %cst_19 {dimension_numbers = #tpu.dot_dimension_numbers<[1], [0], [0], [1], [0, 0, 1, 1], [], []>} : vector<8x128xbf16>, vector<128x128xbf16>, vector<8x128xf32> -> vector<8x128xf32>
      %c0_20 = arith.constant 0 : index
      %c0_21 = arith.constant 0 : index
      %26 = vector.load %arg8[%c0_20, %c0_21] : memref<1x128xf32, #tpu.memory_space<vmem>>, vector<1x128xf32>
      %27 = vector.broadcast %26 : vector<1x128xf32> to vector<8x128xf32>
      %28 = arith.addf %25, %27 : vector<8x128xf32>
      %c0_22 = arith.constant 0 : index
      %c0_23 = arith.constant 0 : index
      %29 = vector.load %arg9[%c0_22, %c0_23] : memref<8x128xf32, #tpu.memory_space<vmem>>, vector<8x128xf32>
      tpu.vector_store %arg9[%c0_22, %c0_23], %28 {strides = array<i32>} : memref<8x128xf32, #tpu.memory_space<vmem>>, vector<8x128xf32>,
    } else {
    }
    return
  }
  func.func @transform_0(%arg0: i32, %arg1: i32) -> (i32, i32) {
    %c0_i32 = arith.constant 0 : i32
    return %arg0, %arg1 : i32, i32
  }
  func.func @transform_1(%arg0: i32, %arg1: i32) -> (i32, i32) {
    %c0_i32 = arith.constant 0 : i32
    %c0_i32_0 = arith.constant 0 : i32
    return %arg1, %c0_i32 : i32, i32
  }
  func.func @transform_2(%arg0: i32, %arg1: i32) -> (i32, i32) {
    %c0_i32 = arith.constant 0 : i32
    %c0_i32_0 = arith.constant 0 : i32
    %c0_i32_1 = arith.constant 0 : i32
    return %c0_i32, %c0_i32_0 : i32, i32
  }
  func.func @transform_3(%arg0: i32, %arg1: i32) -> (i32, i32) {
    %c0_i32 = arith.constant 0 : i32
    %c0_i32_0 = arith.constant 0 : i32
    %c0_i32_1 = arith.constant 0 : i32
    return %c0_i32, %c0_i32_0 : i32, i32
  }
  func.func @transform_4(%arg0: i32, %arg1: i32) -> (i32, i32) {
    %c0_i32 = arith.constant 0 : i32
    %c0_i32_0 = arith.constant 0 : i32
    %c0_i32_1 = arith.constant 0 : i32
    return %c0_i32, %c0_i32_0 : i32, i32
  }
  func.func @transform_5(%arg0: i32, %arg1: i32) -> (i32, i32) {
    %c0_i32 = arith.constant 0 : i32
    %c0_i32_0 = arith.constant 0 : i32
    %c0_i32_1 = arith.constant 0 : i32
    return %c0_i32, %c0_i32_0 : i32, i32
  }
  func.func @transform_6(%arg0: i32, %arg1: i32) -> (i32, i32) {
    %c0_i32 = arith.constant 0 : i32
    %c0_i32_0 = arith.constant 0 : i32
    %c0_i32_1 = arith.constant 0 : i32
    return %c0_i32, %c0_i32_0 : i32, i32
  }
  func.func @transform_7(%arg0: i32, %arg1: i32) -> (i32, i32) {
    %c0_i32 = arith.constant 0 : i32
    %c0_i32_0 = arith.constant 0 : i32
    return %arg0, %c0_i32 : i32, i32
  }
}

</mosaic_0001>

<bundles_post_ra>
// kernel: class_mlp_pallas.1
= control target key start
LH: loop header
LB: loop body
LE: loop exit
PB: predicated region body
PF: predicated region fallthrough
CT: control target
= control target key end

     0   :  { %12 = vsyncpa [#allocation4], 0  ;;  %s618_s0 = inlined_call_operand.vmem [shape: bf16[8,128], index: 0, kind: input, shape index: {}]   ;;  %s619_s1 = inlined_call_operand.hbm [shape: bf16[128,128], index: 1, kind: input, shape index: {}]   ;;  %s620_s2 = inlined_call_operand.vmem [shape: f32[1,128], index: 2, kind: input, shape index: {}]   ;;  %s621_s3 = inlined_call_operand.hbm [shape: bf16[128,128], index: 3, kind: input, shape index: {}]   ;;  %s622_s4 = inlined_call_operand.vmem [shape: f32[1,128], index: 4, kind: input, shape index: {}]   ;;  %s623_s5 = inlined_call_operand.hbm [shape: bf16[128,128], index: 5, kind: input, shape index: {}]   ;;  %s624_s6 = inlined_call_operand.vmem [shape: f32[1,128], index: 6, kind: input, shape index: {}]   ;;  %s625_s7 = inlined_call_operand.vmem [shape: f32[8,128], index: 7, kind: output, shape index: {}]  }
   0x1   :  { %13 = vsyncpa [#allocation6], 0  ;;  %s35_s26 = sshll.u32 %s621_s3, 4  ;;  %s549_s27 = smov [#allocation5]   ;;  %s36_s26 = int_to_ptr.hbm [resolvable:$true] %s35_s26 }
   0x2   :  { %s37_s28 = sshll.u32 %s549_s27, 4  ;;  %s20_s8 = sshll.u32 %s619_s1, 4  ;;  %s38_s28 = int_to_ptr.vmem [resolvable:$true] %s37_s28  ;;  %s21_s8 = int_to_ptr.hbm [resolvable:$true] %s20_s8 }
   0x3   :  { %s550_s9 = smov 64   ;;  %s551_s10 = smov 4  }
   0x4   :  { %43 = dma.hbm_to_vmem [thread:$0]  %s36_s26, 1024, %s38_s28, [#allocation6], %s550_s9, %s550_s9, %s551_s10  }
   0x5   :  { %s552_s11 = smov [#allocation3]   ;;  %s50_s15 = sshll.u32 %s623_s5, 4  ;;  %s51_s15 = int_to_ptr.hbm [resolvable:$true] %s50_s15 }
   0x6   :  { %s22_s12 = sshll.u32 %s552_s11, 4  ;;  %s553_s3 = smov [#allocation7]   ;;  %s23_s12 = int_to_ptr.vmem [resolvable:$true] %s22_s12 }
   0x7   :  { %28 = dma.hbm_to_vmem [thread:$0]  %s21_s8, 1024, %s23_s12, [#allocation4], %s550_s9, %s550_s9, %s551_s10  }
   0x8   :  { %s52_s16 = sshll.u32 %s553_s3, 4  ;;  %s53_s16 = int_to_ptr.vmem [resolvable:$true] %s52_s16 }
   0x9   :  { %58 = dma.hbm_to_vmem [thread:$0]  %s51_s15, 1024, %s53_s16, [#allocation6], %s550_s9, %s550_s9, %s551_s10  }
   0xa   :  { %545 = dma.done.wait [#allocation4], 1024  }
   0xb   :  { %546 = vsyncadd [#allocation4], 4294966272 }
   0xc   :  { %547 = dma.done.wait [#allocation6], 2048  }
   0xd   :  { %548 = vsyncadd [#allocation6], 4294965248  ;;  %v448_v0 = vld [vmem:[#allocation3 + $0x38] sm:$0xff]  ;;  %v447_v1 = vld [vmem:[#allocation3 + $0x30] sm:$0xff] }
   0xe   :  { %138 = vmatpush.bf16.msra.mxu0 %v448_v0  ;;  %v456_v2 = vld [vmem:[#allocation5 + $0x38] sm:$0xff]  ;;  %v455_v3 = vld [vmem:[#allocation5 + $0x30] sm:$0xff]  ;;  %v446_v4 = vld [vmem:[#allocation3 + $0x28] sm:$0xff] }
   0xf   :  { %242 = vmatpush.bf16.msra.mxu1 %v456_v2  ;;  %v454_v5 = vld [vmem:[#allocation5 + $0x28] sm:$0xff]  ;;  %v445_v6 = vld [vmem:[#allocation3 + $0x20] sm:$0xff]  ;;  %v444_v8 = vld [vmem:[#allocation3 + $0x18] sm:$0xff] }
  0x10   :  { %v453_v7 = vld [vmem:[#allocation5 + $0x20] sm:$0xff]  ;;  %v452_v9 = vld [vmem:[#allocation5 + $0x18] sm:$0xff]  ;;  %v443_v10 = vld [vmem:[#allocation3 + $0x10] sm:$0xff] }
  0x11   :  { %v451_v11 = vld [vmem:[#allocation5 + $0x10] sm:$0xff]  ;;  %v442_v12 = vld [vmem:[#allocation3 + $0x8] sm:$0xff]  ;;  %v441_v13 = vld [vmem:[#allocation3] sm:$0xff] }
  0x12   :  { %139 = vmatpush.bf16.msra.mxu0 %v447_v1  ;;  %v73_v14 = vld [vmem:[%s618_s0] sm:$0xf]  ;;  %v450_v15 = vld [vmem:[#allocation5 + $0x8] sm:$0xff]  ;;  %v464_v17 = vld [vmem:[#allocation7 + $0x38] sm:$0xff] }
  0x13   :  { %243 = vmatpush.bf16.msra.mxu1 %v455_v3  ;;  %v449_v16 = vld [vmem:[#allocation5] sm:$0xff]  ;;  %325 = vmatpush.bf16.msra.mxu2 %v464_v17  ;;  %v463_v18 = vld [vmem:[#allocation7 + $0x30] sm:$0xff]  ;;  %v462_v19 = vld [vmem:[#allocation7 + $0x28] sm:$0xff] }
  0x14   :  { %v461_v20 = vld [vmem:[#allocation7 + $0x20] sm:$0xff]  ;;  %v460_v21 = vld [vmem:[#allocation7 + $0x18] sm:$0xff]  ;;  %v459_v22 = vld [vmem:[#allocation7 + $0x10] sm:$0xff] }
  0x15   :  { %v470_v23 = vld [vmem:[%s620_s2] ss:$0 sm:$0xff]  ;;  %v458_v29 = vld [vmem:[#allocation7 + $0x8] sm:$0xff] }
  0x16   :  { %140 = vmatpush.bf16.msra.mxu0 %v446_v4  ;;  %v457_v30 = vld [vmem:[#allocation7] sm:$0xff] }
  0x17   :  { %244 = vmatpush.bf16.msra.mxu1 %v454_v5  ;;  %326 = vmatpush.bf16.msra.mxu2 %v463_v18  ;;  %v471_v31 = vld [vmem:[%s622_s4] ss:$0 sm:$0xff] }
  0x18   :  { %v472_v37 = vld [vmem:[%s624_s6] ss:$0 sm:$0xff] }
  0x1a   :  { %141 = vmatpush.bf16.msra.mxu0 %v445_v6 }
  0x1b   :  { %245 = vmatpush.bf16.msra.mxu1 %v453_v7  ;;  %327 = vmatpush.bf16.msra.mxu2 %v462_v19 }
  0x1e   :  { %142 = vmatpush.bf16.msra.mxu0 %v444_v8 }
  0x1f   :  { %246 = vmatpush.bf16.msra.mxu1 %v452_v9  ;;  %328 = vmatpush.bf16.msra.mxu2 %v461_v20 }
  0x22   :  { %143 = vmatpush.bf16.msra.mxu0 %v443_v10 }
  0x23   :  { %247 = vmatpush.bf16.msra.mxu1 %v451_v11  ;;  %329 = vmatpush.bf16.msra.mxu2 %v460_v21 }
  0x26   :  { %144 = vmatpush.bf16.msra.mxu0 %v442_v12 }
  0x27   :  { %248 = vmatpush.bf16.msra.mxu1 %v450_v15  ;;  %330 = vmatpush.bf16.msra.mxu2 %v459_v22 }
  0x2a   :  { %145 = vmatpush.bf16.msra.mxu0 %v441_v13 }
  0x2b   :  { %249 = vmatpush.bf16.msra.mxu1 %v449_v16  ;;  %331 = vmatpush.bf16.msra.mxu2 %v458_v29 }
  0x2d   :  { %146 = vmatmul.bf16.vlgmr.msra.gmra.mxu0 %v73_v14 }
  0x2f   :  { %332 = vmatpush.bf16.msra.mxu2 %v457_v30 }
  0xaa   :  { %v147_v24 = vpop.f32.mrf.mxu0 }
  0xab   :  { %v159_v25 = vadd.f32 %v470_v23, %v147_v24 }
  0xad   :  { %v172_v26 = vmax.f32 %v159_v25, 0.0 }
  0xaf   :  { %v173_v27 = vpack.c.bf16 %v172_v26, %v172_v26 }
  0xb1   :  { %250 = vmatmul.bf16.vlgmr.msra.gmra.mxu1 %v173_v27 }
  0xb2   :  { %v149_v28 = vpop.f32.mrf.mxu0 }
 0x12e   :  { %v251_v32 = vpop.f32.mrf.mxu1 }
 0x12f   :  { %v252_v33 = vadd.f32 %v471_v31, %v251_v32 }
 0x131   :  { %v255_v34 = vmax.f32 %v252_v33, 0.0 }
 0x133   :  { %v256_v35 = vpack.c.bf16 %v255_v34, %v255_v34 }
 0x135   :  { %333 = vmatmul.bf16.vlgmr.msra.gmra.mxu2 %v256_v35 }
 0x136   :  { %v253_v36 = vpop.f32.mrf.mxu1 }
 0x1b8   :  { %v334_v38 = vpop.f32.mrf.mxu2 }
 0x1b9   :  { %v335_v39 = vadd.f32 %v472_v37, %v334_v38 }
 0x1bb   :  { %338 = vst [vmem:[%s625_s7] sm:$0xff] %v335_v39 }
 0x1c0   :  { %v336_v40 = vpop.f32.mrf.mxu2 }
 0x1c1   :  { %343 = vsyncpa [#allocation4], 1 }
 0x1c2   :  { %344 = vsyncpa [#allocation6], 1 }

// kernel: class_mlp_pallas.1
= control target key start
LH: loop header
LB: loop body
LE: loop exit
PB: predicated region body
PF: predicated region fallthrough
CT: control target
= control target key end

     0   :  { %12 = vsyncpa [#allocation4], 0  ;;  %s618_s0 = inlined_call_operand.vmem [shape: bf16[8,128], index: 0, kind: input, shape index: {}]   ;;  %s619_s1 = inlined_call_operand.hbm [shape: bf16[128,128], index: 1, kind: input, shape index: {}]   ;;  %s620_s2 = inlined_call_operand.vmem [shape: f32[1,128], index: 2, kind: input, shape index: {}]   ;;  %s621_s3 = inlined_call_operand.hbm [shape: bf16[128,128], index: 3, kind: input, shape index: {}]   ;;  %s622_s4 = inlined_call_operand.vmem [shape: f32[1,128], index: 4, kind: input, shape index: {}]   ;;  %s623_s5 = inlined_call_operand.hbm [shape: bf16[128,128], index: 5, kind: input, shape index: {}]   ;;  %s624_s6 = inlined_call_operand.vmem [shape: f32[1,128], index: 6, kind: input, shape index: {}]   ;;  %s625_s7 = inlined_call_operand.vmem [shape: f32[8,128], index: 7, kind: output, shape index: {}]  }
   0x1   :  { %13 = vsyncpa [#allocation6], 0  ;;  %s35_s26 = sshll.u32 %s621_s3, 4  ;;  %s549_s27 = smov [#allocation5]   ;;  %s36_s26 = int_to_ptr.hbm [resolvable:$true] %s35_s26 }
   0x2   :  { %s37_s28 = sshll.u32 %s549_s27, 4  ;;  %s20_s8 = sshll.u32 %s619_s1, 4  ;;  %s38_s28 = int_to_ptr.vmem [resolvable:$true] %s37_s28  ;;  %s21_s8 = int_to_ptr.hbm [resolvable:$true] %s20_s8 }
   0x3   :  { %s550_s9 = smov 64   ;;  %s551_s10 = smov 4  }
   0x4   :  { %43 = dma.hbm_to_vmem [thread:$0]  %s36_s26, 1024, %s38_s28, [#allocation6], %s550_s9, %s550_s9, %s551_s10  }
   0x5   :  { %s552_s11 = smov [#allocation3]   ;;  %s50_s15 = sshll.u32 %s623_s5, 4  ;;  %s51_s15 = int_to_ptr.hbm [resolvable:$true] %s50_s15 }
   0x6   :  { %s22_s12 = sshll.u32 %s552_s11, 4  ;;  %s553_s3 = smov [#allocation7]   ;;  %s23_s12 = int_to_ptr.vmem [resolvable:$true] %s22_s12 }
   0x7   :  { %28 = dma.hbm_to_vmem [thread:$0]  %s21_s8, 1024, %s23_s12, [#allocation4], %s550_s9, %s550_s9, %s551_s10  }
   0x8   :  { %s52_s16 = sshll.u32 %s553_s3, 4  ;;  %s53_s16 = int_to_ptr.vmem [resolvable:$true] %s52_s16 }
   0x9   :  { %58 = dma.hbm_to_vmem [thread:$0]  %s51_s15, 1024, %s53_s16, [#allocation6], %s550_s9, %s550_s9, %s551_s10  }
   0xa   :  { %545 = dma.done.wait [#allocation4], 1024  }
   0xb   :  { %546 = vsyncadd [#allocation4], 4294966272 }
   0xc   :  { %547 = dma.done.wait [#allocation6], 2048  }
   0xd   :  { %548 = vsyncadd [#allocation6], 4294965248  ;;  %v448_v0 = vld [vmem:[#allocation3 + $0x38] sm:$0xff]  ;;  %v447_v1 = vld [vmem:[#allocation3 + $0x30] sm:$0xff] }
   0xe   :  { %138 = vmatpush.bf16.msra.mxu0 %v448_v0  ;;  %v456_v2 = vld [vmem:[#allocation5 + $0x38] sm:$0xff]  ;;  %v455_v3 = vld [vmem:[#allocation5 + $0x30] sm:$0xff]  ;;  %v446_v4 = vld [vmem:[#allocation3 + $0x28] sm:$0xff] }
   0xf   :  { %242 = vmatpush.bf16.msra.mxu1 %v456_v2  ;;  %v454_v5 = vld [vmem:[#allocation5 + $0x28] sm:$0xff]  ;;  %v445_v6 = vld [vmem:[#allocation3 + $0x20] sm:$0xff]  ;;  %v444_v8 = vld [vmem:[#allocation3 + $0x18] sm:$0xff] }
  0x10   :  { %v453_v7 = vld [vmem:[#allocation5 + $0x20] sm:$0xff]  ;;  %v452_v9 = vld [vmem:[#allocation5 + $0x18] sm:$0xff]  ;;  %v443_v10 = vld [vmem:[#allocation3 + $0x10] sm:$0xff] }
  0x11   :  { %v451_v11 = vld [vmem:[#allocation5 + $0x10] sm:$0xff]  ;;  %v442_v12 = vld [vmem:[#allocation3 + $0x8] sm:$0xff]  ;;  %v441_v13 = vld [vmem:[#allocation3] sm:$0xff] }
  0x12   :  { %139 = vmatpush.bf16.msra.mxu0 %v447_v1  ;;  %v73_v14 = vld [vmem:[%s618_s0] sm:$0xf]  ;;  %v450_v15 = vld [vmem:[#allocation5 + $0x8] sm:$0xff]  ;;  %v464_v17 = vld [vmem:[#allocation7 + $0x38] sm:$0xff] }
  0x13   :  { %243 = vmatpush.bf16.msra.mxu1 %v455_v3  ;;  %v449_v16 = vld [vmem:[#allocation5] sm:$0xff]  ;;  %325 = vmatpush.bf16.msra.mxu2 %v464_v17  ;;  %v463_v18 = vld [vmem:[#allocation7 + $0x30] sm:$0xff]  ;;  %v462_v19 = vld [vmem:[#allocation7 + $0x28] sm:$0xff] }
  0x14   :  { %v461_v20 = vld [vmem:[#allocation7 + $0x20] sm:$0xff]  ;;  %v460_v21 = vld [vmem:[#allocation7 + $0x18] sm:$0xff]  ;;  %v459_v22 = vld [vmem:[#allocation7 + $0x10] sm:$0xff] }
  0x15   :  { %v470_v23 = vld [vmem:[%s620_s2] ss:$0 sm:$0xff]  ;;  %v458_v29 = vld [vmem:[#allocation7 + $0x8] sm:$0xff] }
  0x16   :  { %140 = vmatpush.bf16.msra.mxu0 %v446_v4  ;;  %v457_v30 = vld [vmem:[#allocation7] sm:$0xff] }
  0x17   :  { %244 = vmatpush.bf16.msra.mxu1 %v454_v5  ;;  %326 = vmatpush.bf16.msra.mxu2 %v463_v18  ;;  %v471_v31 = vld [vmem:[%s622_s4] ss:$0 sm:$0xff] }
  0x18   :  { %v472_v37 = vld [vmem:[%s624_s6] ss:$0 sm:$0xff] }
  0x1a   :  { %141 = vmatpush.bf16.msra.mxu0 %v445_v6 }
  0x1b   :  { %245 = vmatpush.bf16.msra.mxu1 %v453_v7  ;;  %327 = vmatpush.bf16.msra.mxu2 %v462_v19 }
  0x1e   :  { %142 = vmatpush.bf16.msra.mxu0 %v444_v8 }
  0x1f   :  { %246 = vmatpush.bf16.msra.mxu1 %v452_v9  ;;  %328 = vmatpush.bf16.msra.mxu2 %v461_v20 }
  0x22   :  { %143 = vmatpush.bf16.msra.mxu0 %v443_v10 }
  0x23   :  { %247 = vmatpush.bf16.msra.mxu1 %v451_v11  ;;  %329 = vmatpush.bf16.msra.mxu2 %v460_v21 }
  0x26   :  { %144 = vmatpush.bf16.msra.mxu0 %v442_v12 }
  0x27   :  { %248 = vmatpush.bf16.msra.mxu1 %v450_v15  ;;  %330 = vmatpush.bf16.msra.mxu2 %v459_v22 }
  0x2a   :  { %145 = vmatpush.bf16.msra.mxu0 %v441_v13 }
  0x2b   :  { %249 = vmatpush.bf16.msra.mxu1 %v449_v16  ;;  %331 = vmatpush.bf16.msra.mxu2 %v458_v29 }
  0x2d   :  { %146 = vmatmul.bf16.vlgmr.msra.gmra.mxu0 %v73_v14 }
  0x2f   :  { %332 = vmatpush.bf16.msra.mxu2 %v457_v30 }
  0xaa   :  { %v147_v24 = vpop.f32.mrf.mxu0 }
  0xab   :  { %v159_v25 = vadd.f32 %v470_v23, %v147_v24 }
  0xad   :  { %v172_v26 = vmax.f32 %v159_v25, 0.0 }
  0xaf   :  { %v173_v27 = vpack.c.bf16 %v172_v26, %v172_v26 }
  0xb1   :  { %250 = vmatmul.bf16.vlgmr.msra.gmra.mxu1 %v173_v27 }
  0xb2   :  { %v149_v28 = vpop.f32.mrf.mxu0 }
 0x12e   :  { %v251_v32 = vpop.f32.mrf.mxu1 }
 0x12f   :  { %v252_v33 = vadd.f32 %v471_v31, %v251_v32 }
 0x131   :  { %v255_v34 = vmax.f32 %v252_v33, 0.0 }
 0x133   :  { %v256_v35 = vpack.c.bf16 %v255_v34, %v255_v34 }
 0x135   :  { %333 = vmatmul.bf16.vlgmr.msra.gmra.mxu2 %v256_v35 }
 0x136   :  { %v253_v36 = vpop.f32.mrf.mxu1 }
 0x1b8   :  { %v334_v38 = vpop.f32.mrf.mxu2 }
 0x1b9   :  { %v335_v39 = vadd.f32 %v472_v37, %v334_v38 }
 0x1bb   :  { %338 = vst [vmem:[%s625_s7] sm:$0xff] %v335_v39 }
 0x1c0   :  { %v336_v40 = vpop.f32.mrf.mxu2 }
 0x1c1   :  { %343 = vsyncpa [#allocation4], 1 }
 0x1c2   :  { %344 = vsyncpa [#allocation6], 1 }

</bundles_post_ra>
